<compile_context>
chip_gen: v6e
topology: v6e:2x2x1
jax: 0.10.0
libtpu: 0.0.40
codegen_flags: <defaults>
</compile_context>

<pallas_src>
import functools

import jax
import jax.numpy as jnp
from jax.experimental import pallas as pl
from jax.experimental.pallas import tpu as pltpu

_LANE = 128
_SUBLANE = 8


def _round_up(n, m):
    return ((n + m - 1) // m) * m


def _max_tb_for_vmem(d_in, h, o, vmem_budget_bytes=8 << 20):
    """Largest lane-multiple batch tile whose VMEM footprint (double-buffered
    x^T / out blocks + f32 intermediates) stays inside a conservative budget
    that is safe on every generation (v5e 16 MiB scoped, v7x 32 MiB/64 MiB)."""
    per_col = 4 * (2 * (_round_up(d_in, _SUBLANE) + _round_up(o, _SUBLANE))
                   + h + 3 * _round_up(o, _SUBLANE))
    tb = (vmem_budget_bytes // per_col) // _LANE * _LANE
    return max(_LANE, tb)


def policy_net_kernel(xt_ref, w1t_ref, b1_ref, w2t_ref, b2_ref, out_ref):
    """One batch tile, batch-on-lanes layout.

      xt : [D_in, TB]   (batch along the lane axis)
      w1t: [H, D_in]    b1: [H, 1]
      w2t: [O, H]       b2: [O, 1]
      out: [O, TB]      (softmax over axis 0 = action axis)
    """
    xt = xt_ref[...].astype(jnp.float32)
    w1t = w1t_ref[...].astype(jnp.float32)
    d_in = xt_ref.shape[0]

    if d_in <= 8:
        # Tiny contraction (CartPole D_in = 4): fc1 as D_in broadcast
        # multiply-adds on the VPU; keeps the MXU free so fc2 issues at once.
        h = w1t[:, 0:1] * xt[0:1, :]
        for k in range(1, d_in):
            h = h + w1t[:, k:k + 1] * xt[k:k + 1, :]
    else:
        h = jnp.dot(w1t, xt, preferred_element_type=jnp.float32)
    h = jnp.maximum(h + b1_ref[...].astype(jnp.float32), 0.0)

    # fc2 on the MXU, f32 accumulation.
    logits = jnp.dot(w2t_ref[...].astype(jnp.float32), h,
                     preferred_element_type=jnp.float32)
    logits = logits + b2_ref[...].astype(jnp.float32)

    # Numerically stable softmax over the action axis.  Exact divide: the
    # previous approx reciprocal was the source of the reference mismatch.
    m = jnp.max(logits, axis=0, keepdims=True)
    e = jnp.exp(logits - m)
    denom = jnp.sum(e, axis=0, keepdims=True)
    out_ref[...] = (e / denom).astype(out_ref.dtype)


def prepare_policy_params(w1, b1, w2, b2):
    """One-time weight re-layout (outside the per-step forward): transposed
    weights and column biases for the batch-on-lanes kernel."""
    w1t = jnp.asarray(w1).T                # [H, D_in]
    b1c = jnp.asarray(b1).reshape(-1, 1)   # [H, 1]
    w2t = jnp.asarray(w2).T                # [O, H]
    b2c = jnp.asarray(b2).reshape(-1, 1)   # [O, 1]
    return w1t, b1c, w2t, b2c


@functools.partial(jax.jit, static_argnames=("tb",))
def policy_net_forward(x, w1t, b1c, w2t, b2c, *, tb=2048):
    """x: [B, D_in]; prepared params from prepare_policy_params -> probs [B, O]."""
    B, D_in = x.shape
    H = w1t.shape[0]
    O = w2t.shape[0]

    # --- batch tile: lane-multiple, as large as the VMEM budget allows -------
    TB = min(_round_up(tb, _LANE), _max_tb_for_vmem(D_in, H, O),
             _round_up(B, _LANE))
    B_pad = _round_up(B, TB)
    num_tiles = B_pad // TB

    # Batch -> lanes.  Padding columns (zeros) produce softmax(b2) garbage that
    # is sliced away below; they never create NaNs.
    xt = x.T
    if B_pad != B:
        xt = jnp.zeros((D_in, B_pad), x.dtype).at[:, :B].set(xt)

    cost = pl.CostEstimate(
        flops=2 * B_pad * D_in * H + 2 * B_pad * H * O,
        transcendentals=B_pad * O,
        bytes_accessed=(xt.size * xt.dtype.itemsize
                        + w1t.size * w1t.dtype.itemsize
                        + b1c.size * b1c.dtype.itemsize
                        + w2t.size * w2t.dtype.itemsize
                        + b2c.size * b2c.dtype.itemsize
                        + B_pad * O * 4),
    )

    probs_t = pl.pallas_call(
        policy_net_kernel,
        out_shape=jax.ShapeDtypeStruct((O, B_pad), jnp.float32),
        grid=(num_tiles,),
        in_specs=[
            pl.BlockSpec((D_in, TB), lambda i: (0, i)),   # x^T: batch-tiled on lanes
            pl.BlockSpec((H, D_in), lambda i: (0, 0)),    # W1^T: VMEM-resident
            pl.BlockSpec((H, 1), lambda i: (0, 0)),       # b1
            pl.BlockSpec((O, H), lambda i: (0, 0)),       # W2^T: VMEM-resident
            pl.BlockSpec((O, 1), lambda i: (0, 0)),       # b2
        ],
        out_specs=pl.BlockSpec((O, TB), lambda i: (0, i)),  # lane-dense [O, TB]
        compiler_params=pltpu.CompilerParams(
            dimension_semantics=("parallel",)),
        cost_estimate=cost,
    )(xt, w1t, b1c, w2t, b2c)

    # [O, B_pad] -> [B, O].  Only O*B f32 moved; negligible vs. the padded-O
    # slab the previous layout wrote and re-read.
    return probs_t[:, :B].T


if __name__ == "__main__":
    # CartPole-like sizes: state dim 4, hidden 32, 2 actions.
    batch, input_dim, hidden_dim, output_dim = 256, 4, 32, 2

    key = jax.random.PRNGKey(0)
    k_x, k_w1, k_b1, k_w2, k_b2 = jax.random.split(key, 5)

    x = jax.random.normal(k_x, (batch, input_dim), dtype=jnp.float32)

    # nn.Linear-style init (weights stored here as [in, out]).
    lim1 = 1.0 / jnp.sqrt(input_dim)
    w1 = jax.random.uniform(k_w1, (input_dim, hidden_dim), jnp.float32, -lim1, lim1)
    b1 = jax.random.uniform(k_b1, (hidden_dim,), jnp.float32, -lim1, lim1)
    lim2 = 1.0 / jnp.sqrt(hidden_dim)
    w2 = jax.random.uniform(k_w2, (hidden_dim, output_dim), jnp.float32, -lim2, lim2)
    b2 = jax.random.uniform(k_b2, (output_dim,), jnp.float32, -lim2, lim2)

    # One-time weight re-layout (kept out of the per-step forward).
    params = prepare_policy_params(w1, b1, w2, b2)

    # Reference in plain JAX.
    h_ref = jnp.maximum(x @ w1 + b1, 0.0)
    probs_ref = jax.nn.softmax(h_ref @ w2 + b2, axis=1)

    # 1) Default large tile (single-tile pass at this batch size).
    probs = policy_net_forward(x, *params)
    jax.block_until_ready(probs)
    assert probs.shape == (batch, output_dim)
    assert jnp.allclose(probs, probs_ref, atol=1e-4), "mismatch vs reference"
    assert jnp.allclose(jnp.sum(probs, axis=1), 1.0, atol=1e-4)

    # 2) Small tile to exercise the multi-tile ("parallel") grid path.
    probs_tiled = policy_net_forward(x, *params, tb=128)
    jax.block_until_ready(probs_tiled)
    assert jnp.allclose(probs_tiled, probs_ref, atol=1e-4), "mismatch (tiled)"

    print("KERNEL_OK")
</pallas_src>

<mosaic_0001>
module attributes {stable_mosaic.version = 11 : i64} {
  func.func @policy_net_kernel(%arg0: i32, %arg1: memref<4x256xf32, #tpu.memory_space<vmem>>, %arg2: memref<32x4xf32, #tpu.memory_space<vmem>>, %arg3: memref<32x1xf32, #tpu.memory_space<vmem>>, %arg4: memref<2x32xf32, #tpu.memory_space<vmem>>, %arg5: memref<2x1xf32, #tpu.memory_space<vmem>>, %arg6: memref<2x256xf32, #tpu.memory_space<vmem>>) attributes {dimension_semantics = [#tpu.dimension_semantics<parallel>], iteration_bounds = array<i64: 1>, scalar_prefetch = 0 : i64, scratch_operands = 0 : i64, tpu.core_type = #tpu.core_type<tc>, window_params = [{transform_indices = @transform_0, window_bounds = array<i64: 4, 256>}, {pipeline_mode = #tpu.pipeline_mode<synchronous>, transform_indices = @transform_1, window_bounds = array<i64: 32, 4>}, {pipeline_mode = #tpu.pipeline_mode<synchronous>, transform_indices = @transform_2, window_bounds = array<i64: 32, 1>}, {pipeline_mode = #tpu.pipeline_mode<synchronous>, transform_indices = @transform_3, window_bounds = array<i64: 2, 32>}, {pipeline_mode = #tpu.pipeline_mode<synchronous>, transform_indices = @transform_4, window_bounds = array<i64: 2, 1>}, {transform_indices = @transform_5, window_bounds = array<i64: 2, 256>}]} {
    %c0 = arith.constant 0 : index
    %c0_0 = arith.constant 0 : index
    %0 = vector.load %arg1[%c0, %c0_0] : memref<4x256xf32, #tpu.memory_space<vmem>>, vector<4x256xf32>
    %c0_1 = arith.constant 0 : index
    %c0_2 = arith.constant 0 : index
    %1 = vector.load %arg2[%c0_1, %c0_2] : memref<32x4xf32, #tpu.memory_space<vmem>>, vector<32x4xf32>
    %2 = vector.extract_strided_slice %1 {offsets = [0, 0], sizes = [32, 1], strides = [1, 1]} : vector<32x4xf32> to vector<32x1xf32>
    %3 = vector.extract_strided_slice %0 {offsets = [0, 0], sizes = [1, 256], strides = [1, 1]} : vector<4x256xf32> to vector<1x256xf32>
    %4 = vector.broadcast %2 : vector<32x1xf32> to vector<32x256xf32>
    %5 = vector.broadcast %3 : vector<1x256xf32> to vector<32x256xf32>
    %6 = arith.mulf %4, %5 : vector<32x256xf32>
    %7 = vector.extract_strided_slice %1 {offsets = [0, 1], sizes = [32, 1], strides = [1, 1]} : vector<32x4xf32> to vector<32x1xf32>
    %8 = vector.extract_strided_slice %0 {offsets = [1, 0], sizes = [1, 256], strides = [1, 1]} : vector<4x256xf32> to vector<1x256xf32>
    %9 = vector.broadcast %7 : vector<32x1xf32> to vector<32x256xf32>
    %10 = vector.broadcast %8 : vector<1x256xf32> to vector<32x256xf32>
    %11 = arith.mulf %9, %10 : vector<32x256xf32>
    %12 = arith.addf %6, %11 : vector<32x256xf32>
    %13 = vector.extract_strided_slice %1 {offsets = [0, 2], sizes = [32, 1], strides = [1, 1]} : vector<32x4xf32> to vector<32x1xf32>
    %14 = vector.extract_strided_slice %0 {offsets = [2, 0], sizes = [1, 256], strides = [1, 1]} : vector<4x256xf32> to vector<1x256xf32>
    %15 = vector.broadcast %13 : vector<32x1xf32> to vector<32x256xf32>
    %16 = vector.broadcast %14 : vector<1x256xf32> to vector<32x256xf32>
    %17 = arith.mulf %15, %16 : vector<32x256xf32>
    %18 = arith.addf %12, %17 : vector<32x256xf32>
    %19 = vector.extract_strided_slice %1 {offsets = [0, 3], sizes = [32, 1], strides = [1, 1]} : vector<32x4xf32> to vector<32x1xf32>
    %20 = vector.extract_strided_slice %0 {offsets = [3, 0], sizes = [1, 256], strides = [1, 1]} : vector<4x256xf32> to vector<1x256xf32>
    %21 = vector.broadcast %19 : vector<32x1xf32> to vector<32x256xf32>
    %22 = vector.broadcast %20 : vector<1x256xf32> to vector<32x256xf32>
    %23 = arith.mulf %21, %22 : vector<32x256xf32>
    %24 = arith.addf %18, %23 : vector<32x256xf32>
    %c0_3 = arith.constant 0 : index
    %c0_4 = arith.constant 0 : index
    %25 = vector.load %arg3[%c0_3, %c0_4] : memref<32x1xf32, #tpu.memory_space<vmem>>, vector<32x1xf32>
    %26 = vector.broadcast %25 : vector<32x1xf32> to vector<32x256xf32>
    %27 = arith.addf %24, %26 : vector<32x256xf32>
    %cst = arith.constant 0.000000e+00 : f32
    %28 = vector.broadcast %cst : f32 to vector<32x256xf32>
    %29 = arith.maximumf %27, %28 : vector<32x256xf32>
    %c0_5 = arith.constant 0 : index
    %c0_6 = arith.constant 0 : index
    %30 = vector.load %arg4[%c0_5, %c0_6] : memref<2x32xf32, #tpu.memory_space<vmem>>, vector<2x32xf32>
    %cst_7 = arith.constant dense<0.000000e+00> : vector<2x256xf32>
    %31 = tpu.matmul %30, %29, %cst_7 {dimension_numbers = #tpu.dot_dimension_numbers<[1], [0], [0], [1], [0, 0, 1, 1], [], []>} : vector<2x32xf32>, vector<32x256xf32>, vector<2x256xf32> -> vector<2x256xf32>
    %c0_8 = arith.constant 0 : index
    %c0_9 = arith.constant 0 : index
    %32 = vector.load %arg5[%c0_8, %c0_9] : memref<2x1xf32, #tpu.memory_space<vmem>>, vector<2x1xf32>
    %33 = vector.broadcast %32 : vector<2x1xf32> to vector<2x256xf32>
    %34 = arith.addf %31, %33 : vector<2x256xf32>
    %cst_10 = arith.constant dense<0xFF800000> : vector<256xf32>
    %35 = vector.multi_reduction <maximumf>, %34, %cst_10 [0] : vector<2x256xf32> to vector<256xf32>
    %36 = vector.shape_cast %35 : vector<256xf32> to vector<1x256xf32>
    %37 = vector.broadcast %36 : vector<1x256xf32> to vector<2x256xf32>
    %38 = arith.subf %34, %37 : vector<2x256xf32>
    %39 = math.exp %38 : vector<2x256xf32>
    %cst_11 = arith.constant dense<0.000000e+00> : vector<256xf32>
    %40 = vector.multi_reduction <add>, %39, %cst_11 [0] : vector<2x256xf32> to vector<256xf32>
    %41 = vector.shape_cast %40 : vector<256xf32> to vector<1x256xf32>
    %42 = vector.broadcast %41 : vector<1x256xf32> to vector<2x256xf32>
    %43 = arith.divf %39, %42 : vector<2x256xf32>
    %c0_12 = arith.constant 0 : index
    %c0_13 = arith.constant 0 : index
    %44 = vector.load %arg6[%c0_12, %c0_13] : memref<2x256xf32, #tpu.memory_space<vmem>>, vector<2x256xf32>
    tpu.vector_store %arg6[%c0_12, %c0_13], %43 {strides = array<i32>} : memref<2x256xf32, #tpu.memory_space<vmem>>, vector<2x256xf32>,
    return
  }
  func.func @transform_0(%arg0: i32) -> (i32, i32) {
    %c0_i32 = arith.constant 0 : i32
    %c0_i32_0 = arith.constant 0 : i32
    return %c0_i32, %arg0 : i32, i32
  }
  func.func @transform_1(%arg0: i32) -> (i32, i32) {
    %c0_i32 = arith.constant 0 : i32
    %c0_i32_0 = arith.constant 0 : i32
    %c0_i32_1 = arith.constant 0 : i32
    return %c0_i32, %c0_i32_0 : i32, i32
  }
  func.func @transform_2(%arg0: i32) -> (i32, i32) {
    %c0_i32 = arith.constant 0 : i32
    %c0_i32_0 = arith.constant 0 : i32
    %c0_i32_1 = arith.constant 0 : i32
    return %c0_i32, %c0_i32_0 : i32, i32
  }
  func.func @transform_3(%arg0: i32) -> (i32, i32) {
    %c0_i32 = arith.constant 0 : i32
    %c0_i32_0 = arith.constant 0 : i32
    %c0_i32_1 = arith.constant 0 : i32
    return %c0_i32, %c0_i32_0 : i32, i32
  }
  func.func @transform_4(%arg0: i32) -> (i32, i32) {
    %c0_i32 = arith.constant 0 : i32
    %c0_i32_0 = arith.constant 0 : i32
    %c0_i32_1 = arith.constant 0 : i32
    return %c0_i32, %c0_i32_0 : i32, i32
  }
  func.func @transform_5(%arg0: i32) -> (i32, i32) {
    %c0_i32 = arith.constant 0 : i32
    %c0_i32_0 = arith.constant 0 : i32
    return %c0_i32, %arg0 : i32, i32
  }
}

</mosaic_0001>

<bundles_post_ra>
// kernel: policy_net_forward.1
= control target key start
LH: loop header
LB: loop body
LE: loop exit
PB: predicated region body
PF: predicated region fallthrough
CT: control target
= control target key end

     0   :  { %v465_v2 = vmov 1   ;;  %v466_v3 = vmov 0   ;;  %s567_s0 = inlined_call_operand.vmem [shape: f32[4,256], index: 0, kind: input, shape index: {}]   ;;  %s568_s1 = inlined_call_operand.vmem [shape: f32[32,4], index: 1, kind: input, shape index: {}]   ;;  %s569_s2 = inlined_call_operand.vmem [shape: f32[32,1], index: 2, kind: input, shape index: {}]   ;;  %s570_s3 = inlined_call_operand.vmem [shape: f32[2,32], index: 3, kind: input, shape index: {}]   ;;  %s571_s4 = inlined_call_operand.vmem [shape: f32[2,1], index: 4, kind: input, shape index: {}]   ;;  %s572_s5 = inlined_call_operand.hbm [shape: f32[2,256], index: 5, kind: output, shape index: {}]  }
   0x1   :  { %v25_v0 = vld [vmem:[%s568_s1 + $0x18] sm:$0xff]  ;;  %v24_v1 = vld [vmem:[%s568_s1 + $0x10] sm:$0xff]  ;;  %418 = vset.pattern.permute.xlu0 %v465_v2  ;;  %420 = vset.pattern.permute.xlu1 %v466_v3 }
   0x2   :  { %86 = vperm.xlu0 %418, %v25_v0   ;;  %38 = vperm.xlu1 %420, %v24_v1  }
   0x3   :  { %10 = vsyncpa [#allocation3], 0  ;;  %v23_v4 = vld [vmem:[%s568_s1 + $0x8] sm:$0xff]  ;;  %v467_v5 = vmov 2   ;;  %v468_v6 = vmov 3   ;;  %v22_v7 = vld [vmem:[%s568_s1] sm:$0xff]  ;;  %v47_v18 = vlaneseq }
   0x4   :  { %v225_v8 = vld [vmem:[%s569_s2 + $0x10] sm:$0xff]  ;;  %v264_v9 = vld [vmem:[%s571_s4] sm:$0x3]  ;;  %v226_v10 = vld [vmem:[%s569_s2 + $0x18] sm:$0xff]  ;;  %v469_v13 = vmov 0.0   ;;  %vm270_vm0 = vcmask 261120  }
   0x5   :  { %v224_v11 = vld [vmem:[%s569_s2 + $0x8] sm:$0xff]  ;;  %v223_v12 = vld [vmem:[%s569_s2] sm:$0xff]  ;;  %338 = vmatprep.mubr.f32.mxu0 %v469_v13  ;;  %v48_v21 = vshrl.u32 %v47_v18, 7  ;;  %vm345_vm1 = vcmask 1041408  }
   0x6   :  { %419 = vset.pattern.permute.xlu0 %v466_v3  ;;  %421 = vset.pattern.permute.xlu1 %v465_v2  ;;  %v21_v28 = vld [vmem:[%s567_s0] sm:$0xff] }
   0x7   :  { %43 = vperm.xlu0 %419, %v25_v0   ;;  %82 = vperm.xlu1 %421, %v24_v1   ;;  %v95_v23 = vsub.s32 5, %v48_v21  ;;  %v49_v25 = vsub.s32 0, %v48_v21  ;;  %v53_v26 = vsub.s32 4, %v48_v21  ;;  %v91_v27 = vsub.s32 1, %v48_v21 }
   0x8   :  { %v141_v31 = vsub.s32 2, %v48_v21  ;;  %v145_v32 = vsub.s32 6, %v48_v21  ;;  %v191_v37 = vsub.s32 3, %v48_v21  ;;  %v195_v38 = vsub.s32 7, %v48_v21 }
   0x9   :  { %v96_v29 = vrot.slane %v21_v28, %v95_v23  ;;  %v50_v33 = vrot.slane %v21_v28, %v49_v25  ;;  %v54_v34 = vrot.slane %v21_v28, %v53_v26  ;;  %v92_v35 = vrot.slane %v21_v28, %v91_v27 }
   0xa   :  { %v142_v40 = vrot.slane %v21_v28, %v141_v31  ;;  %v146_v41 = vrot.slane %v21_v28, %v145_v32  ;;  %v192_v46 = vrot.slane %v21_v28, %v191_v37  ;;  %v196_v47 = vrot.slane %v21_v28, %v195_v38 }
   0xb   :  { %422 = vset.pattern.permute.xlu1 %v467_v5  ;;  %33 = vperm.xlu0 %419, %v23_v4   ;;  %v535_v39 = vrot.slane %v96_v29, %v91_v27  ;;  %v537_v43 = vrot.slane %v50_v33, %v49_v25  ;;  %v539_v44 = vrot.slane %v54_v34, %v49_v25 }
   0xc   :  { %136 = vperm.xlu1 %422, %v25_v0   ;;  %v102_v45 = vrot.slane %v92_v35, %v91_v27  ;;  %v152_v54 = vrot.slane %v142_v40, %v141_v31  ;;  %v156_v55 = vrot.slane %v146_v41, %v141_v31  ;;  %v202_v59 = vrot.slane %v192_v46, %v191_v37 }
   0xd   :  { %v206_v60 = vrot.slane %v196_v47, %v191_v37 }
   0xf   :  { %427 = vset.pattern.permute.xlu0 %v467_v5 }
  0x10   :  { %423 = vset.pattern.permute.xlu1 %v465_v2  ;;  %128 = vperm.xlu0 %427, %v23_v4  }
  0x11   :  { %78 = vperm.xlu1 %423, %v23_v4  }
  0x14   :  { %428 = vset.pattern.permute.xlu0 %v468_v6 }
  0x15   :  { %424 = vset.pattern.permute.xlu1 %v467_v5  ;;  %186 = vperm.xlu0 %428, %v25_v0  }
  0x16   :  { %132 = vperm.xlu1 %424, %v24_v1  }
  0x19   :  { %178 = vperm.xlu0 %428, %v23_v4  }
  0x1a   :  { %425 = vset.pattern.permute.xlu1 %v466_v3 }
  0x1b   :  { %28 = vperm.xlu1 %425, %v22_v7  }
  0x1d   :  { %433 = vset.pattern.permute.xlu0 %v466_v3 }
  0x1e   :  { %239 = vperm.xlu0 %433, %v225_v8  }
  0x1f   :  { %426 = vset.pattern.permute.xlu1 %v465_v2 }
  0x20   :  { %74 = vperm.xlu1 %426, %v22_v7  }
  0x22   :  { %267 = vperm.xlu0 %433, %v264_v9  }
  0x24   :  { %429 = vset.pattern.permute.xlu1 %v468_v6 }
  0x25   :  { %182 = vperm.xlu1 %429, %v24_v1  }
  0x29   :  { %430 = vset.pattern.permute.xlu1 %v467_v5 }
  0x2a   :  { %124 = vperm.xlu1 %430, %v22_v7  }
  0x2e   :  { %431 = vset.pattern.permute.xlu1 %v466_v3 }
  0x2f   :  { %244 = vperm.xlu1 %431, %v226_v10  }
  0x33   :  { %432 = vset.pattern.permute.xlu1 %v468_v6 }
  0x34   :  { %174 = vperm.xlu1 %432, %v22_v7  }
  0x38   :  { %434 = vset.pattern.permute.xlu1 %v466_v3 }
  0x39   :  { %234 = vperm.xlu1 %434, %v224_v11  }
  0x3d   :  { %229 = vperm.xlu1 %434, %v223_v12  }
  0x7d   :  { %v39_v14 = vpop.permute.xlu1 %38  ;;  %v87_v16 = vpop.permute.xlu0 %86 }
  0x7e   :  { %v113_v48 = vmul.f32 %v102_v45, %v87_v16  ;;  %v114_v52 = vmul.f32 %v535_v39, %v87_v16  ;;  %v70_v56 = vmul.f32 %v539_v44, %v39_v14  ;;  %v69_v62 = vmul.f32 %v537_v43, %v39_v14 }
  0x82   :  { %v83_v15 = vpop.permute.xlu1 %82  ;;  %v44_v19 = vpop.permute.xlu0 %43 }
  0x83   :  { %v112_v49 = vmul.f32 %v535_v39, %v83_v15  ;;  %v71_v50 = vmul.f32 %v537_v43, %v44_v19  ;;  %v72_v53 = vmul.f32 %v539_v44, %v44_v19  ;;  %v111_v57 = vmul.f32 %v102_v45, %v83_v15 }
  0x85   :  { %v120_v63 = vadd.f32 %v112_v49, %v70_v56  ;;  %v121_v0 = vadd.f32 %v113_v48, %v71_v50  ;;  %v122_v2 = vadd.f32 %v114_v52, %v72_v53  ;;  %v119_v6 = vadd.f32 %v111_v57, %v69_v62 }
  0x86   :  { %v34_v24 = vpop.permute.xlu0 %33 }
  0x87   :  { %v137_v17 = vpop.permute.xlu1 %136  ;;  %v67_v18 = vmul.f32 %v537_v43, %v34_v24  ;;  %v68_v19 = vmul.f32 %v539_v44, %v34_v24 }
  0x88   :  { %v163_v3 = vmul.f32 %v152_v54, %v137_v17  ;;  %v164_v4 = vmul.f32 %v156_v55, %v137_v17 }
  0x8a   :  { %v171_v15 = vadd.f32 %v163_v3, %v121_v0  ;;  %v172_v16 = vadd.f32 %v164_v4, %v122_v2 }
  0x8b   :  { %v129_v36 = vpop.permute.xlu0 %128 }
  0x8c   :  { %v528_v20 = vpop.permute.xlu1 %78  ;;  %v159_v28 = vmul.f32 %v152_v54, %v129_v36  ;;  %v160_v35 = vmul.f32 %v156_v55, %v129_v36 }
  0x8d   :  { %v109_v21 = vmul.f32 %v102_v45, %v528_v20  ;;  %v110_v17 = vmul.f32 %v535_v39, %v528_v20 }
  0x8f   :  { %v117_v33 = vadd.f32 %v109_v21, %v67_v18  ;;  %v118_v34 = vadd.f32 %v110_v17, %v68_v19 }
  0x90   :  { %v187_v51 = vpop.permute.xlu0 %186 }
  0x91   :  { %v133_v22 = vpop.permute.xlu1 %132  ;;  %v213_v9 = vmul.f32 %v202_v59, %v187_v51  ;;  %v214_v10 = vmul.f32 %v206_v60, %v187_v51  ;;  %v167_v49 = vadd.f32 %v159_v28, %v117_v33  ;;  %v168_v50 = vadd.f32 %v160_v35, %v118_v34 }
  0x92   :  { %v162_v61 = vmul.f32 %v156_v55, %v133_v22  ;;  %v161_v1 = vmul.f32 %v152_v54, %v133_v22 }
  0x93   :  { %v221_v25 = vadd.f32 %v213_v9, %v171_v15  ;;  %v222_v26 = vadd.f32 %v214_v10, %v172_v16 }
  0x94   :  { %v179_v7 = vpop.permute.xlu0 %178  ;;  %v170_v11 = vadd.f32 %v162_v61, %v120_v63  ;;  %v169_v13 = vadd.f32 %v161_v1, %v119_v6 }
  0x95   :  { %v209_v40 = vmul.f32 %v202_v59, %v179_v7  ;;  %v210_v41 = vmul.f32 %v206_v60, %v179_v7 }
  0x96   :  { %v533_v30 = vpop.permute.xlu1 %28 }
  0x97   :  { %v65_v52 = vmul.f32 %v537_v43, %v533_v30  ;;  %v66_v36 = vmul.f32 %v539_v44, %v533_v30  ;;  %v218_v57 = vadd.f32 %v210_v41, %v168_v50 }
  0x99   :  { %v240_v22 = vpop.permute.xlu0 %239 }
  0x9b   :  { %v75_v42 = vpop.permute.xlu1 %74 }
  0x9c   :  { %v107_v46 = vmul.f32 %v102_v45, %v75_v42  ;;  %v108_v20 = vmul.f32 %v535_v39, %v75_v42  ;;  %v217_v45 = vadd.f32 %v209_v40, %v167_v49 }
  0x9e   :  { %v115_v39 = vadd.f32 %v107_v46, %v65_v52  ;;  %v116_v42 = vadd.f32 %v108_v20, %v66_v36 }
  0xa0   :  { %v183_v58 = vpop.permute.xlu1 %182 }
  0xa1   :  { %v212_v5 = vmul.f32 %v206_v60, %v183_v58  ;;  %v211_v8 = vmul.f32 %v202_v59, %v183_v58 }
  0xa3   :  { %v220_v14 = vadd.f32 %v212_v5, %v170_v11  ;;  %v219_v23 = vadd.f32 %v211_v8, %v169_v13 }
  0xa5   :  { %v125_v12 = vpop.permute.xlu1 %124  ;;  %v252_v29 = vadd.f32 %v240_v22, %v220_v14  ;;  %v251_v37 = vadd.f32 %v240_v22, %v219_v23 }
  0xa6   :  { %v157_v53 = vmul.f32 %v152_v54, %v125_v12  ;;  %v158_v56 = vmul.f32 %v156_v55, %v125_v12 }
  0xa7   :  { %v260_v47 = vmax.f32 %v252_v29, 0.0  ;;  %v259_v51 = vmax.f32 %v251_v37, 0.0 }
  0xa8   :  { %v165_v63 = vadd.f32 %v157_v53, %v115_v39  ;;  %v166_v0 = vadd.f32 %v158_v56, %v116_v42 }
  0xaa   :  { %v245_v27 = vpop.permute.xlu1 %244 }
  0xab   :  { %v253_v31 = vadd.f32 %v245_v27, %v221_v25  ;;  %v254_v32 = vadd.f32 %v245_v27, %v222_v26 }
  0xad   :  { %v262_v38 = vmax.f32 %v254_v32, 0.0  ;;  %v261_v24 = vmax.f32 %v253_v31, 0.0 }
  0xaf   :  { %v175_v48 = vpop.permute.xlu1 %174  ;;  %298 = vmatprep.subr.mxu0 %v262_v38 }
  0xb0   :  { %299 = vmatpush1.msra.mxu0 %v261_v24  ;;  %v207_v58 = vmul.f32 %v202_v59, %v175_v48  ;;  %v208_v61 = vmul.f32 %v206_v60, %v175_v48  ;;  %v263_v59 = vld [vmem:[%s570_s3] sm:$0x3]  ;;  %v268_v60 = vpop.permute.xlu0 %267  ;;  %s470_s3 = smov [#allocation2]  }
  0xb1   :  { %300 = vmatprep.subr.mxu0 %v260_v47  ;;  %s402_s11 = sshll.u32 %s470_s3, 4  ;;  %s403_s11 = int_to_ptr.vmem [resolvable:$true] %s402_s11 }
  0xb2   :  { %301 = vmatpush1.msra.mxu0 %v259_v51  ;;  %v215_v4 = vadd.f32 %v207_v58, %v165_v63  ;;  %v216_v5 = vadd.f32 %v208_v61, %v166_v0  ;;  %s443_s12 = scalar_lea.vmem %s403_s11, 64  ;;  %p448_p1 = scmp.lt.s32.totalorder %s403_s11, %s403_s11 }
  0xb3   :  { %p444_p0 = scmp.ne.s32.totalorder %s403_s11, %s443_s12  ;;  %p449_p2 = scmp.lt.s32.totalorder %s443_s12, %s443_s12 }
  0xb4   :  { %v235_v62 = vpop.permute.xlu1 %234 }
  0xb5   :  { %v249_v1 = vadd.f32 %v235_v62, %v217_v45  ;;  %v250_v2 = vadd.f32 %v235_v62, %v218_v57  ;;  %p450_p3 = por %p449_p2, %p448_p1 }
  0xb7   :  { %v257_v3 = vmax.f32 %v249_v1, 0.0  ;;  %v258_v43 = vmax.f32 %v250_v2, 0.0  ;;  %p451_p4 = pnand %p450_p3, %p444_p0 }
  0xb8   :  { %v230_v30 = vpop.permute.xlu1 %229 }
  0xb9   :  { %v247_v44 = vadd.f32 %v230_v30, %v215_v4  ;;  %v248_v54 = vadd.f32 %v230_v30, %v216_v5  ;;  %302 = vmatprep.subr.mxu0 %v258_v43 }
  0xba   :  { %303 = vmatpush1.msra.mxu0 %v257_v3 }
  0xbb   :  { %v255_v55 = vmax.f32 %v247_v44, 0.0  ;;  %v256_v6 = vmax.f32 %v248_v54, 0.0 }
  0xbd   :  { %304 = vmatprep.subr.mxu0 %v256_v6 }
  0xbe   :  { %305 = vmatpush1.msra.mxu0 %v255_v55 }
  0xbf   :  { %410 = vmatmul.mubr.msk.f32.vlgmr.msra.gmra.mxu0 %vm270_vm0, %v263_v59 }
 0x17f   :  { %v340_v7 = vpop.f32.mrf.mxu0 }
 0x180   :  { %v341_v8 = vadd.f32 %v340_v7, %v268_v60 }
 0x181   :  { %v342_v9 = vpop.f32.mrf.mxu0 }
 0x182   :  { %v346_v10 = vsel %vm345_vm1, %v341_v8, -inf  ;;  %v343_v11 = vadd.f32 %v342_v9, %v268_v60 }
 0x183   :  { %v347_v12 = vrot.slane %v346_v10, 4 }
 0x184   :  { %v353_v13 = vsel %vm345_vm1, %v343_v11, -inf }
 0x185   :  { %v348_v15 = vmax.f32 %v346_v10, %v347_v12  ;;  %v354_v16 = vrot.slane %v353_v13, 4 }
 0x187   :  { %v349_v18 = vrot.slane %v348_v15, 2  ;;  %v355_v14 = vmax.f32 %v353_v13, %v354_v16 }
 0x189   :  { %v350_v19 = vmax.f32 %v348_v15, %v349_v18  ;;  %v356_v21 = vrot.slane %v355_v14, 2 }
 0x18b   :  { %v351_v17 = vrot.slane %v350_v19, 1  ;;  %v357_v22 = vmax.f32 %v355_v14, %v356_v21 }
 0x18d   :  { %v352_v23 = vmax.f32 %v350_v19, %v351_v17  ;;  %v358_v25 = vrot.slane %v357_v22, 1 }
 0x18f   :  { %v360_v26 = vsub.f32 %v341_v8, %v352_v23  ;;  %v359_v27 = vmax.f32 %v357_v22, %v358_v25 }
 0x191   :  { %v362_v28 = vmul.f32 1.442695, %v360_v26  ;;  %v361_v29 = vsub.f32 %v343_v11, %v359_v27 }
 0x193   :  { %435 = vpow2.f32 %v362_v28  ;;  %v364_v31 = vmul.f32 1.442695, %v361_v29 }
 0x195   :  { %437 = vpow2.f32 %v364_v31 }
 0x1a0   :  { %v436_v32 = vpop.eup %435 }
 0x1a1   :  { %v366_v33 = vsel %vm345_vm1, %v436_v32, 0.0 }
 0x1a2   :  { %v438_v34 = vpop.eup %437  ;;  %v367_v35 = vrot.slane %v366_v33, 4 }
 0x1a3   :  { %v373_v37 = vsel %vm345_vm1, %v438_v34, 0.0 }
 0x1a4   :  { %v368_v38 = vadd.f32 %v367_v35, %v366_v33  ;;  %v374_v24 = vrot.slane %v373_v37, 4 }
 0x1a6   :  { %v369_v40 = vrot.slane %v368_v38, 2  ;;  %v375_v41 = vadd.f32 %v374_v24, %v373_v37 }
 0x1a8   :  { %v370_v46 = vadd.f32 %v369_v40, %v368_v38  ;;  %v376_v20 = vrot.slane %v375_v41, 2 }
 0x1aa   :  { %v371_v47 = vrot.slane %v370_v46, 1  ;;  %v377_v48 = vadd.f32 %v376_v20, %v375_v41 }
 0x1ac   :  { %v372_v49 = vadd.f32 %v371_v47, %v370_v46  ;;  %v378_v50 = vrot.slane %v377_v48, 1 }
 0x1ae   :  { %439 = vrcp.f32 %v372_v49  ;;  %v379_v51 = vadd.f32 %v378_v50, %v377_v48 }
 0x1b0   :  { %441 = vrcp.f32 %v379_v51 }
 0x1bb   :  { %v440_v52 = vpop.eup %439 }
 0x1bc   :  { %v381_v53 = vmul.f32 %v440_v52, %v436_v32 }
 0x1bd   :  { %v442_v36 = vpop.eup %441 }
 0x1be   :  { %v383_v56 = vmul.f32 %v442_v36, %v438_v34 }
 0x1c0   :  { %v386_v45 = vcombine.low %v381_v53, %v383_v56 }
 0x1c2   :  { %411 = vst.sshfl [vmem:[#allocation2] sm:$0x33 pattern:$0x76325410] %v386_v45 }
 0x1c3   :  { %454 = shalt.err (!%p451_p4)
}
 0x1c4   :  { %405 = dma.vmem_to_hbm [thread:$0]  %s403_s11, 64, %s572_s5, [#allocation3]  }
 0x1c5   :  { %463 = dma.done.wait [#allocation3], 64  }
 0x1c6   :  { %464 = vsyncadd [#allocation3], 4294967232 }
 0x1c7   :  { %409 = vsyncpa [#allocation3], 1 }

</bundles_post_ra>
